<compile_context>
chip_gen: v5e
topology: v5e:2x2
jax: 0.10.0
libtpu: 0.0.40
codegen_flags: <defaults>
</compile_context>

<pallas_src>
import numpy as np
import jax
import jax.numpy as jnp
from jax.experimental import pallas as pl
from jax.experimental.pallas import tpu as pltpu


# ----------------------------------------------------------------------------
# DFT / inverse-DFT matrices (rfft / irfft as linear operators), float64
# ----------------------------------------------------------------------------
def rfft_matrices(T_in, M_in):
    t = np.arange(T_in)
    m = np.arange(M_in)
    ang = 2.0 * np.pi * np.outer(m, t) / T_in
    # X[m] = sum_t x[t] * exp(-2*pi*i*m*t/T)
    return np.cos(ang), -np.sin(ang)                      # each (M_in, T_in)


def irfft_matrices(M_out, T_out):
    # irfft with default length N = 2*(M_out-1) (even by construction),
    # "backward" norm, then slice [:T_out].
    N = 2 * (M_out - 1)
    n = np.arange(N)
    k = np.arange(M_out)
    ang = 2.0 * np.pi * np.outer(n, k) / N
    scale = np.full(M_out, 2.0)
    scale[0] = 1.0
    scale[-1] = 1.0          # Nyquist column: valid because N is even here
    A_re = (np.cos(ang) / N) * scale
    A_im = (-np.sin(ang) / N) * scale
    A_im[:, 0] = 0.0         # imag of DC / Nyquist never reaches a real output
    A_im[:, -1] = 0.0
    return A_re[:T_out], A_im[:T_out]                     # each (T_out, M_out)


def fourier_modes(T_in, T_out):
    M_in = T_in // 2 + 1
    M_out = (T_out // 2 + 2) if (T_out % 2 != 0) else (T_out // 2 + 1)
    return M_in, M_out


def _round_up(n, m):
    return ((n + m - 1) // m) * m


# ----------------------------------------------------------------------------
# Pallas kernel: one MXU matmul (f32 accumulate) + bias
# ----------------------------------------------------------------------------
def _wtfl_kernel(x_ref, w_ref, b_ref, o_ref):
    acc = jnp.dot(x_ref[...], w_ref[...], preferred_element_type=jnp.float32)
    o_ref[...] = (acc + b_ref[...]).astype(o_ref.dtype)


# ----------------------------------------------------------------------------
# Parameter construction (deterministic, in-script)
# ----------------------------------------------------------------------------
def make_params(key, T_in, T_out, S_in, S_out):
    M_in, M_out = fourier_modes(T_in, T_out)
    ks = jax.random.split(key, 8)
    sc_f = 1.0 / np.sqrt(M_in * S_in)
    sc_t = 1.0 / np.sqrt(T_in * S_in)
    sc_a = 1.0 / np.sqrt(2 * T_out)
    return dict(
        wf_re=sc_f * jax.random.normal(ks[0], (M_in, S_in, M_out, S_out), jnp.float32),
        wf_im=sc_f * jax.random.normal(ks[1], (M_in, S_in, M_out, S_out), jnp.float32),
        bf_re=sc_f * jax.random.normal(ks[2], (M_out, S_out), jnp.float32),
        bf_im=sc_f * jax.random.normal(ks[3], (M_out, S_out), jnp.float32),
        wt=sc_t * jax.random.normal(ks[4], (T_in, S_in, T_out, S_out), jnp.float32),
        bt=sc_t * jax.random.normal(ks[5], (T_out, S_out), jnp.float32),
        wagg=sc_a * jax.random.normal(ks[6], (T_out, 2 * T_out), jnp.float32),
        bagg=sc_a * jax.random.normal(ks[7], (T_out,), jnp.float32),
    )


# ----------------------------------------------------------------------------
# One-time host-side constant folding:  out = x @ W_all + b_all
# (call once; keep the returned device arrays around, NOT per forward call)
# ----------------------------------------------------------------------------
def precompute_operands(p, T_in, T_out, S_in, S_out, weight_dtype=jnp.float32):
    M_in, M_out = fourier_modes(T_in, T_out)
    F_re, F_im = rfft_matrices(T_in, M_in)            # (M_in, T_in)
    A_re, A_im = irfft_matrices(M_out, T_out)         # (T_out, M_out)
    I_si = np.eye(S_in)
    I_so = np.eye(S_out)

    # Block-diagonal DFT / IDFT operators acting on the (time*state) flat layout.
    FbT_re = np.kron(F_re, I_si).T                    # (Ti*Si, Mi*Si)
    FbT_im = np.kron(F_im, I_si).T
    AbT_re = np.kron(A_re, I_so).T                    # (Mo*So, To*So)
    AbT_im = np.kron(A_im, I_so).T

    Wf_re = np.asarray(p["wf_re"], np.float64).reshape(M_in * S_in, M_out * S_out)
    Wf_im = np.asarray(p["wf_im"], np.float64).reshape(M_in * S_in, M_out * S_out)
    bf_re = np.asarray(p["bf_re"], np.float64).reshape(1, M_out * S_out)
    bf_im = np.asarray(p["bf_im"], np.float64).reshape(1, M_out * S_out)
    Wt = np.asarray(p["wt"], np.float64).reshape(T_in * S_in, T_out * S_out)
    bt = np.asarray(p["bt"], np.float64).reshape(1, T_out * S_out)
    Wagg = np.asarray(p["wagg"], np.float64)
    bagg = np.asarray(p["bagg"], np.float64)

    # Frequency branch folded: x @ W_freq + b_freq  ==  irfft(W_c * rfft(x) + b_c)
    W1_re = FbT_re @ Wf_re - FbT_im @ Wf_im
    W1_im = FbT_re @ Wf_im + FbT_im @ Wf_re
    W_freq = W1_re @ AbT_re + W1_im @ AbT_im          # (Ti*Si, To*So)
    b_freq = bf_re @ AbT_re + bf_im @ AbT_im          # (1, To*So)

    # Aggregator Linear(2*To -> To) applied per-state (concat folded into halves).
    WaggbT = np.kron(Wagg, I_so).T                    # (2*To*So, To*So)
    Wagg_f = WaggbT[: T_out * S_out]
    Wagg_t = WaggbT[T_out * S_out:]
    bagg_rep = np.repeat(bagg, S_out)[None, :]        # (1, To*So)

    # Everything is linear in x -> single weight + single bias.
    W_all = W_freq @ Wagg_f + Wt @ Wagg_t             # (Ti*Si, To*So)
    b_all = b_freq @ Wagg_f + bt @ Wagg_t + bagg_rep  # (1, To*So)

    # Pad ONLY the output feature dim to a lane-dense multiple of 128.
    Din, Dout = T_in * S_in, T_out * S_out
    Dout_pad = _round_up(Dout, 128)
    W_pad = np.zeros((Din, Dout_pad), np.float64)
    W_pad[:, :Dout] = W_all
    b_pad = np.zeros((1, Dout_pad), np.float64)
    b_pad[0, :Dout] = b_all[0]

    return jnp.asarray(W_pad, weight_dtype), jnp.asarray(b_pad, jnp.float32)


# ----------------------------------------------------------------------------
# Wrapper
# ----------------------------------------------------------------------------
def _vmem_capacity_bytes():
    try:
        return int(pltpu.get_tpu_info().vmem_capacity_bytes)
    except Exception:
        return 64 * 1024 * 1024          # conservative default (v7x per-core)


def _pick_batch_tile(B, requested):
    # Sublane-aligned (multiple of 8); never exceed the requested (sweepable)
    # tile, and prefer >= 2 grid steps so v7x's second TensorCore has work.
    bt = min(requested, _round_up(B, 8))
    if B >= 16 and pl.cdiv(B, bt) < 2:
        bt = _round_up(pl.cdiv(B, 2), 8)
    return bt


def weighted_time_frequency_linear(x, W_pad, b_pad, T_out, S_out, *,
                                   batch_tile=512, out_dtype=None,
                                   return_padded=False):
    """out = x @ W_pad + b_pad as a single Pallas GEMM.

    x:     (B, T_in, S_in)
    W_pad: (T_in*S_in, Dout_pad) float32, Dout_pad = round_up(T_out*S_out, 128)
    b_pad: (1, Dout_pad) float32
    """
    B, T_in, S_in = x.shape
    Din = T_in * S_in
    Dout = T_out * S_out
    assert W_pad.shape[0] == Din, (W_pad.shape, Din)
    Dout_pad = W_pad.shape[1]
    out_dtype = x.dtype if out_dtype is None else jnp.dtype(out_dtype)

    bt = _pick_batch_tile(B, batch_tile)
    Bp = _round_up(B, bt)
    x_flat = x.reshape(B, Din)                    # contiguous -> free
    if Bp != B:                                   # pad batch only when ragged
        x_flat = jnp.pad(x_flat, ((0, Bp - B), (0, 0)))

    x_isz = x_flat.dtype.itemsize
    w_isz = W_pad.dtype.itemsize
    o_isz = jnp.dtype(out_dtype).itemsize
    vmem_cap = _vmem_capacity_bytes()
    w_bytes = Din * Dout_pad * w_isz

    if w_bytes <= vmem_cap // 4:
        # Common case: weight + bias fully VMEM-resident (single-buffered,
        # DMA'd once) while batch tiles stream through a 1-D "parallel" grid.
        grid = (Bp // bt,)
        in_specs = [
            pl.BlockSpec((bt, Din), lambda i: (i, 0)),
            pl.BlockSpec(memory_space=pltpu.MemorySpace.VMEM),
            pl.BlockSpec(memory_space=pltpu.MemorySpace.VMEM),
        ]
        out_specs = pl.BlockSpec((bt, Dout_pad), lambda i: (i, 0))
        semantics = ("parallel",)
        need = (2 * bt * Din * x_isz + 2 * bt * Dout_pad * o_isz
                + w_bytes + Dout_pad * 4)
    else:
        # Folded weight too large to hold resident (relevant on v7x's 64 MiB
        # VMEM): add a Dout grid axis and stream (Din, dj) weight blocks.
        dj = 128
        for cand in (4096, 2048, 1024, 512, 256):
            if Dout_pad % cand == 0:
                dj = cand
                break
        grid = (Bp // bt, Dout_pad // dj)
        in_specs = [
            pl.BlockSpec((bt, Din), lambda i, j: (i, 0)),
            pl.BlockSpec((Din, dj), lambda i, j: (0, j)),
            pl.BlockSpec((1, dj), lambda i, j: (0, j)),
        ]
        out_specs = pl.BlockSpec((bt, dj), lambda i, j: (i, j))
        semantics = ("parallel", "parallel")
        need = (2 * bt * Din * x_isz + 2 * bt * dj * o_isz
                + 2 * Din * dj * w_isz + 2 * dj * 4)

    # Generation-aware scoped-VMEM budget with headroom.
    vmem_limit = int(min(max(2 * need + (4 << 20), 32 << 20),
                         (vmem_cap * 9) // 10))

    cost = pl.CostEstimate(
        flops=2 * Bp * Din * Dout_pad,
        transcendentals=0,
        bytes_accessed=(Bp * Din * x_isz + w_bytes + Dout_pad * 4
                        + Bp * Dout_pad * o_isz),
    )

    out_flat = pl.pallas_call(
        _wtfl_kernel,
        out_shape=jax.ShapeDtypeStruct((Bp, Dout_pad), out_dtype),
        grid=grid,
        in_specs=in_specs,
        out_specs=out_specs,
        compiler_params=pltpu.CompilerParams(
            dimension_semantics=semantics,
            vmem_limit_bytes=vmem_limit),
        cost_estimate=cost,
    )(x_flat, W_pad, b_pad)

    if return_padded:
        # Skips the post-kernel slice/reshape HBM round trip; the consumer
        # must ignore rows >= B and columns >= T_out*S_out (padding / bias).
        return out_flat
    return out_flat[:B, :Dout].reshape(B, T_out, S_out)


# ----------------------------------------------------------------------------
# Pure-JAX reference (real FFTs, f32) for validation
# ----------------------------------------------------------------------------
def reference_forward(x, p, T_out):
    Xf = jnp.fft.rfft(x, axis=1)                                  # (B, Mi, Si) complex
    Wc = p["wf_re"] + 1j * p["wf_im"]
    bc = p["bf_re"] + 1j * p["bf_im"]
    Yf = jnp.einsum("bms,msno->bno", Xf, Wc) + bc                 # (B, Mo, So) complex
    freq = jnp.fft.irfft(Yf, axis=1).astype(jnp.float32)[:, :T_out, :]
    tlin = jnp.einsum("bts,tsno->bno", x, p["wt"]) + p["bt"]
    cat = jnp.concatenate([freq, tlin], axis=1)                   # (B, 2*To, So)
    out = jnp.einsum("bks,tk->bts", cat, p["wagg"]) + p["bagg"][None, :, None]
    return out


# ----------------------------------------------------------------------------
if __name__ == "__main__":
    T_in, T_out, S_in, S_out = 16, 7, 4, 3

    key = jax.random.PRNGKey(0)
    kx, kx2, kp = jax.random.split(key, 3)
    params = make_params(kp, T_in, T_out, S_in, S_out)

    # One-time host-side constant folding (f64 fold, f32 storage).
    W_pad, b_pad = precompute_operands(params, T_in, T_out, S_in, S_out)

    # Small batch (single grid step).
    x = jax.random.normal(kx, (2, T_in, S_in), jnp.float32)
    out = jax.block_until_ready(
        weighted_time_frequency_linear(x, W_pad, b_pad, T_out, S_out))
    ref = jax.block_until_ready(reference_forward(x, params, T_out))
    assert out.shape == (2, T_out, S_out), out.shape
    np.testing.assert_allclose(np.asarray(out), np.asarray(ref),
                               rtol=2e-2, atol=2e-2)

    # Larger batch: exercises the multi-step "parallel" grid (>=2 tiles).
    x2 = jax.random.normal(kx2, (64, T_in, S_in), jnp.float32)
    out2 = jax.block_until_ready(
        weighted_time_frequency_linear(x2, W_pad, b_pad, T_out, S_out))
    ref2 = jax.block_until_ready(reference_forward(x2, params, T_out))
    assert out2.shape == (64, T_out, S_out), out2.shape
    np.testing.assert_allclose(np.asarray(out2), np.asarray(ref2),
                               rtol=2e-2, atol=2e-2)

    print("KERNEL_OK")
</pallas_src>

<mosaic_0001>
module attributes {stable_mosaic.version = 11 : i64} {
  func.func @_wtfl_kernel(%arg0: i32, %arg1: memref<8x64xf32, #tpu.memory_space<vmem>>, %arg2: memref<64x128xf32, #tpu.memory_space<vmem>>, %arg3: memref<1x128xf32, #tpu.memory_space<vmem>>, %arg4: memref<8x128xf32, #tpu.memory_space<vmem>>) attributes {dimension_semantics = [#tpu.dimension_semantics<parallel>], iteration_bounds = array<i64: 1>, scalar_prefetch = 0 : i64, scratch_operands = 0 : i64, tpu.core_type = #tpu.core_type<tc>, window_params = [{transform_indices = @transform_0, window_bounds = array<i64: 8, 64>}, {pipeline_mode = #tpu.pipeline_mode<synchronous>, transform_indices = @transform_1, window_bounds = array<i64: 64, 128>}, {pipeline_mode = #tpu.pipeline_mode<synchronous>, transform_indices = @transform_2, window_bounds = array<i64: 1, 128>}, {transform_indices = @transform_3, window_bounds = array<i64: 8, 128>}]} {
    %c0 = arith.constant 0 : index
    %c0_0 = arith.constant 0 : index
    %0 = vector.load %arg1[%c0, %c0_0] : memref<8x64xf32, #tpu.memory_space<vmem>>, vector<8x64xf32>
    %c0_1 = arith.constant 0 : index
    %c0_2 = arith.constant 0 : index
    %1 = vector.load %arg2[%c0_1, %c0_2] : memref<64x128xf32, #tpu.memory_space<vmem>>, vector<64x128xf32>
    %cst = arith.constant dense<0.000000e+00> : vector<8x128xf32>
    %2 = tpu.matmul %0, %1, %cst {dimension_numbers = #tpu.dot_dimension_numbers<[1], [0], [0], [1], [0, 0, 1, 1], [], []>} : vector<8x64xf32>, vector<64x128xf32>, vector<8x128xf32> -> vector<8x128xf32>
    %c0_3 = arith.constant 0 : index
    %c0_4 = arith.constant 0 : index
    %3 = vector.load %arg3[%c0_3, %c0_4] : memref<1x128xf32, #tpu.memory_space<vmem>>, vector<1x128xf32>
    %4 = vector.broadcast %3 : vector<1x128xf32> to vector<8x128xf32>
    %5 = arith.addf %2, %4 : vector<8x128xf32>
    %c0_5 = arith.constant 0 : index
    %c0_6 = arith.constant 0 : index
    %6 = vector.load %arg4[%c0_5, %c0_6] : memref<8x128xf32, #tpu.memory_space<vmem>>, vector<8x128xf32>
    tpu.vector_store %arg4[%c0_5, %c0_6], %5 {strides = array<i32>} : memref<8x128xf32, #tpu.memory_space<vmem>>, vector<8x128xf32>,
    return
  }
  func.func @transform_0(%arg0: i32) -> (i32, i32) {
    %c0_i32 = arith.constant 0 : i32
    %c0_i32_0 = arith.constant 0 : i32
    return %arg0, %c0_i32 : i32, i32
  }
  func.func @transform_1(%arg0: i32) -> (i32, i32) {
    %c0_i32 = arith.constant 0 : i32
    %c0_i32_0 = arith.constant 0 : i32
    %c0_i32_1 = arith.constant 0 : i32
    return %c0_i32, %c0_i32_0 : i32, i32
  }
  func.func @transform_2(%arg0: i32) -> (i32, i32) {
    %c0_i32 = arith.constant 0 : i32
    %c0_i32_0 = arith.constant 0 : i32
    %c0_i32_1 = arith.constant 0 : i32
    return %c0_i32, %c0_i32_0 : i32, i32
  }
  func.func @transform_3(%arg0: i32) -> (i32, i32) {
    %c0_i32 = arith.constant 0 : i32
    %c0_i32_0 = arith.constant 0 : i32
    return %arg0, %c0_i32 : i32, i32
  }
}

</mosaic_0001>

<bundles_post_ra>
// kernel: tpu_custom_call.1
= control target key start
LH: loop header
LB: loop body
LE: loop exit
PB: predicated region body
PF: predicated region fallthrough
CT: control target
= control target key end

     0   :  { %8 = vsyncpa [#allocation3], 0  ;;  %s223_s0 = inlined_call_operand.hbm [shape: f32[8,64], index: 0, kind: input, shape index: {}]   ;;  %s224_s1 = inlined_call_operand.hbm [shape: f32[64,128], index: 1, kind: input, shape index: {}]   ;;  %s225_s2 = inlined_call_operand.vmem [shape: f32[1,128], index: 2, kind: input, shape index: {}]   ;;  %s226_s3 = inlined_call_operand.hbm [shape: f32[8,128], index: 3, kind: output, shape index: {}]  }
   0x1   :  { %9 = vsyncpa [#allocation6], 0 }
   0x2   :  { %10 = vsyncpa [#allocation4], 0  ;;  %s16_s14 = sshll.u32 %s223_s0, 4  ;;  %s186_s15 = smov [#allocation2]   ;;  %s17_s14 = int_to_ptr.hbm [resolvable:$true] %s16_s14 }
   0x3   :  { %s18_s16 = sshll.u32 %s186_s15, 4  ;;  %s26_s19 = sshll.u32 %s224_s1, 4  ;;  %s19_s16 = int_to_ptr.vmem [resolvable:$true] %s18_s16  ;;  %s27_s19 = int_to_ptr.hbm [resolvable:$true] %s26_s19 }
   0x4   :  { %21 = dma.hbm_to_vmem [thread:$0]  %s17_s14, 128, %s19_s16, [#allocation3]  }
   0x5   :  { %s187_s20 = smov [#allocation5]   ;;  %s188_s22 = smov 128  }
   0x6   :  { %s28_s21 = sshll.u32 %s187_s20, 4  ;;  %s189_s23 = smov 8   ;;  %s29_s21 = int_to_ptr.vmem [resolvable:$true] %s28_s21 }
   0x7   :  { %34 = dma.hbm_to_vmem [thread:$0]  %s27_s19, 1024, %s29_s21, [#allocation6], %s188_s22, %s188_s22, %s189_s23  }
   0x8   :  { %180 = dma.done.wait [#allocation3], 128  }
   0x9   :  { %181 = vsyncadd [#allocation3], 4294967168 }
   0xa   :  { %182 = dma.done.wait [#allocation6], 1024  }
   0xb   :  { %183 = vsyncadd [#allocation6], 4294966272  ;;  %v53_v0 = vld [vmem:[#allocation5 + $0x38] sm:$0xff]  ;;  %v52_v1 = vld [vmem:[#allocation5 + $0x30] sm:$0xff]  ;;  %vm58_vm0 = vcmask 523264   ;;  %s190_s24 = smov [#allocation7]  }
   0xc   :  { %70 = vmatpush.msra.mxu0 %v53_v0  ;;  %v51_v2 = vld [vmem:[#allocation5 + $0x28] sm:$0xff]  ;;  %v50_v3 = vld [vmem:[#allocation5 + $0x20] sm:$0xff]  ;;  %v49_v4 = vld [vmem:[#allocation5 + $0x18] sm:$0xff]  ;;  %s88_s25 = sshll.u32 %s190_s24, 4  ;;  %s90_s28 = sshll.u32 %s226_s3, 4  ;;  %s89_s25 = int_to_ptr.vmem [resolvable:$true] %s88_s25  ;;  %s91_s28 = int_to_ptr.hbm [resolvable:$true] %s90_s28 }
   0xd   :  { %v48_v5 = vld [vmem:[#allocation5 + $0x10] sm:$0xff]  ;;  %v47_v6 = vld [vmem:[#allocation5 + $0x8] sm:$0xff]  ;;  %v46_v7 = vld [vmem:[#allocation5] sm:$0xff] }
   0xe   :  { %71 = vmatpush.msra.mxu0 %v52_v1  ;;  %v45_v8 = vld [vmem:[#allocation2] sm:$0xff] }
   0xf   :  { %v107_v9 = vld [vmem:[%s225_s2] ss:$0 sm:$0xff] }
  0x10   :  { %72 = vmatpush.msra.mxu0 %v51_v2 }
  0x12   :  { %73 = vmatpush.msra.mxu0 %v50_v3 }
  0x14   :  { %74 = vmatpush.msra.mxu0 %v49_v4 }
  0x16   :  { %75 = vmatpush.msra.mxu0 %v48_v5 }
  0x18   :  { %76 = vmatpush.msra.mxu0 %v47_v6 }
  0x1a   :  { %77 = vmatpush.msra.mxu0 %v46_v7 }
  0x1b   :  { %101 = vmatmul.msk.f32.vlgmr.msra.gmra.mxu0 %vm58_vm0, %v45_v8 }
  0x98   :  { %v79_v10 = vpop.f32.mrf.mxu0 }
  0x99   :  { %v80_v11 = vadd.f32 %v107_v9, %v79_v10 }
  0x9b   :  { %82 = vst [vmem:[#allocation7] sm:$0xff] %v80_v11 }
  0x9c   :  { %93 = dma.vmem_to_hbm [thread:$0]  %s89_s25, 128, %s91_s28, [#allocation4]  }
  0x9d   :  { %184 = dma.done.wait [#allocation4], 128  }
  0x9e   :  { %185 = vsyncadd [#allocation4], 4294967168 }
  0x9f   :  { %98 = vsyncpa [#allocation3], 1 }
  0xa0   :  { %99 = vsyncpa [#allocation6], 1 }
  0xa1   :  { %100 = vsyncpa [#allocation4], 1 }

</bundles_post_ra>
